<compile_context>
chip_gen: v7x
topology: tpu7x:2x2x1
jax: 0.10.0
libtpu: 0.0.40
codegen_flags: <defaults>
</compile_context>

<pallas_src>
import math
import numpy as np
import jax
import jax.numpy as jnp
from jax.experimental import pallas as pl
from jax.experimental.pallas import tpu as pltpu

LANE = 128
SUB = 8


def _round_up(x, m):
    return ((x + m - 1) // m) * m


def _cdiv(a, b):
    return -(-a // b)


def make_critic_forward(state_size, action_size, fc_units, cat_action_layer=1):
    """Returns (forward, init_params, pack_params) matching the PyTorch Critic."""
    layer_sizes = [state_size] + list(fc_units) + [1]
    L = len(layer_sizes) - 1
    assert L >= 2, "need at least one hidden layer"
    assert 1 <= cat_action_layer <= L - 1, "cat_action_layer out of range"

    # one lane-tight input slab: [ state | action | 0-pad ] -> IN_PAD lanes
    IN_PAD = _round_up(state_size + action_size, LANE)
    # common lane-padded width for hidden activations / weight columns
    C = _round_up(max(list(fc_units) + [1]), LANE)
    BC = max(C, IN_PAD)  # lane width of the f32 bias/final-weight buffer

    # ---- static row offsets of each MXU weight segment (all SUB-aligned) ----
    offsets = {}
    r = 0
    offsets[(0, "x")] = r; r += IN_PAD              # layer 0 consumes the slab
    for i in range(1, L - 1):                       # hidden layers
        offsets[(i, "x")] = r; r += C
        if i == cat_action_layer:
            offsets[(i, "a")] = r; r += IN_PAD      # action part also via slab
    R_total = r
    # bias buffer rows: L biases, then final-layer f32 weight row(s) at L, L+1
    B_ROWS = _round_up(L + 2, SUB)

    # ---- parameter init (mirrors reset_parameters semantics) ----
    def init_params(key):
        params = []
        for i in range(L):
            in_dim = layer_sizes[i] + (action_size if i == cat_action_layer else 0)
            out_dim = layer_sizes[i + 1]
            key, wk = jax.random.split(key)
            # hidden_init uses weight.size()[0] == out_features in the original
            lim = (1.0 / math.sqrt(out_dim)) if i < L - 1 else 0.003
            w = jax.random.uniform(wk, (in_dim, out_dim), jnp.float32, -lim, lim)
            b = jnp.full((out_dim,), 0.1, dtype=jnp.float32)
            params.append((w, b))
        return params

    # ---- pack parameters: bf16 MXU weights + f32 biases/final-layer row ----
    def pack_params(params):
        w_buf = np.zeros((R_total, C), np.float32)
        b_buf = np.zeros((B_ROWS, BC), np.float32)
        for i, (w, b) in enumerate(params):
            w = np.asarray(w, np.float32)
            b = np.asarray(b, np.float32)
            in_main = layer_sizes[i]
            out_i = layer_sizes[i + 1]
            if i == cat_action_layer:
                w_x, w_a = w[:in_main], w[in_main:]          # pre-split cat weight
            else:
                w_x, w_a = w, None
            if i < L - 1:
                r0 = offsets[(i, "x")]
                # layer 0: rows sit at the state lanes [0:state_size] of the slab
                w_buf[r0:r0 + in_main, :out_i] = w_x
                if w_a is not None:
                    ra = offsets[(i, "a")]
                    # action rows sit at slab lanes [state_size : state_size+action_size]
                    w_buf[ra + state_size:ra + state_size + action_size, :out_i] = w_a
            else:
                # final (out_dim == 1) layer kept in f32 inside the bias buffer
                b_buf[L, :in_main] = w_x[:, 0]
                if w_a is not None:
                    b_buf[L + 1, state_size:state_size + action_size] = w_a[:, 0]
            b_buf[i, :out_i] = b
        return (jnp.asarray(w_buf, dtype=jnp.bfloat16),
                jnp.asarray(b_buf, dtype=jnp.float32))

    # ---- fused kernel: whole MLP on one VMEM-resident batch tile ----
    def kernel(x_ref, w_ref, b_ref, out_ref):
        x = x_ref[...]                                   # (Bb, IN_PAD) bf16 slab
        h = None
        for i in range(L - 1):
            r0 = offsets[(i, "x")]
            rows = IN_PAD if i == 0 else C
            w = w_ref[r0:r0 + rows, :]                   # (rows, C) bf16
            inp = x if i == 0 else h.astype(jnp.bfloat16)
            y = jnp.dot(inp, w, preferred_element_type=jnp.float32)
            if i == cat_action_layer:
                ra = offsets[(i, "a")]
                wa = w_ref[ra:ra + IN_PAD, :]            # zero rows at state lanes
                y = y + jnp.dot(x, wa, preferred_element_type=jnp.float32)
            y = y + b_ref[i:i + 1, 0:C]                  # padding cols stay 0
            h = jnp.maximum(y, 0.01 * y)                 # leaky_relu, one VPU op

        # final layer (out_dim == 1): f32 VPU multiply + lane reduce, no MXU pass
        w_row = b_ref[L:L + 1, 0:C]                      # (1, C) f32
        q = jnp.sum(h * w_row, axis=-1, keepdims=True)   # (Bb, 1) f32
        if cat_action_layer == L - 1:
            wa_row = b_ref[L + 1:L + 2, 0:IN_PAD]        # zero at state lanes
            q = q + jnp.sum(x.astype(jnp.float32) * wa_row, axis=-1, keepdims=True)
        out_ref[...] = q + b_ref[L - 1:L, 0:1]

    # ---- batch tile sizing -------------------------------------------------
    def _choose_block_b(B):
        B_pad8 = _round_up(B, SUB)
        if B_pad8 <= 512:
            return B_pad8                                # single tile
        # >= 2 parallel tiles (v7x has 2 TCs); each <= ~1024 rows, M mult of 256
        n_tiles = max(2, _cdiv(B_pad8, 1024))
        return _round_up(_cdiv(B_pad8, n_tiles), 256)

    # ---- jitted wrapper: pack inputs tightly, grid over batch --------------
    @jax.jit
    def forward(state, action, packed):
        w_buf, b_buf = packed
        B = state.shape[0]
        block_b = _choose_block_b(B)
        B_pad = _round_up(B, block_b)

        # lane-tight bf16 input slab: [ state | action | 0-pad ]
        xin = jnp.concatenate([state, action], axis=1).astype(jnp.bfloat16)
        xin = jnp.pad(xin, ((0, B_pad - B),
                            (0, IN_PAD - (state_size + action_size))))

        n_steps = B_pad // block_b
        x_spec_kwargs = {}
        if n_steps >= 3:
            # extra input buffering only pays off with enough grid steps
            x_spec_kwargs = dict(pipeline_mode=pl.Buffered(3))

        out = pl.pallas_call(
            kernel,
            out_shape=jax.ShapeDtypeStruct((B_pad, 1), jnp.float32),
            grid=(n_steps,),
            in_specs=[
                pl.BlockSpec((block_b, IN_PAD), lambda i: (i, 0), **x_spec_kwargs),
                pl.BlockSpec((R_total, C), lambda i: (0, 0)),   # VMEM-resident
                pl.BlockSpec((B_ROWS, BC), lambda i: (0, 0)),   # VMEM-resident
            ],
            out_specs=pl.BlockSpec((block_b, 1), lambda i: (i, 0)),
            compiler_params=pltpu.CompilerParams(
                dimension_semantics=("parallel",),
                vmem_limit_bytes=32 * 1024 * 1024),
        )(xin, w_buf, b_buf)
        return out[:B]

    return forward, init_params, pack_params


def _reference_forward(state, action, params, cat_layer):
    """Pure-JAX reference mirroring kernel numerics:
    bf16 slab/weights on the MXU with f32 accumulation; final 1-wide layer f32."""
    bf = lambda t: t.astype(jnp.bfloat16)
    L = len(params)
    x = bf(state).astype(jnp.float32)     # slab quantization of the raw inputs
    a = bf(action).astype(jnp.float32)
    for i, (w, b) in enumerate(params):
        xin = jnp.concatenate([x, a], axis=1) if i == cat_layer else x
        if i < L - 1:
            y = jnp.dot(bf(xin), bf(w), preferred_element_type=jnp.float32) + b
            x = jnp.maximum(y, 0.01 * y)
        else:
            x = jnp.sum(xin * w[:, 0], axis=-1, keepdims=True) + b
    return x


if __name__ == "__main__":
    # Small deterministic configuration.
    batch = 8
    state_size = 32
    action_size = 8
    fc_units = [64, 48]
    cat_action_layer = 1

    key = jax.random.PRNGKey(0)
    k_state, k_action, k_params = jax.random.split(key, 3)

    state = jax.random.normal(k_state, (batch, state_size), jnp.float32)
    action = jax.random.normal(k_action, (batch, action_size), jnp.float32)

    forward, init_params, pack_params = make_critic_forward(
        state_size, action_size, fc_units, cat_action_layer)
    params = init_params(k_params)
    packed = pack_params(params)

    out = jax.block_until_ready(forward(state, action, packed))

    ref = _reference_forward(state, action, params, cat_action_layer)
    assert out.shape == (batch, 1)
    err = float(jnp.max(jnp.abs(out - ref)))
    assert err < 1e-3, f"mismatch vs reference: max abs err {err}"

    print("KERNEL_OK")
</pallas_src>

<mosaic_0001>
module attributes {stable_mosaic.version = 11 : i64} {
  func.func @kernel(%arg0: i32, %arg1: memref<8x128xbf16, #tpu.memory_space<vmem>>, %arg2: memref<384x128xbf16, #tpu.memory_space<vmem>>, %arg3: memref<8x128xf32, #tpu.memory_space<vmem>>, %arg4: memref<8x1xf32, #tpu.memory_space<vmem>>) attributes {dimension_semantics = [#tpu.dimension_semantics<parallel>], iteration_bounds = array<i64: 1>, scalar_prefetch = 0 : i64, scratch_operands = 0 : i64, tpu.core_type = #tpu.core_type<tc>, window_params = [{transform_indices = @transform_0, window_bounds = array<i64: 8, 128>}, {pipeline_mode = #tpu.pipeline_mode<synchronous>, transform_indices = @transform_1, window_bounds = array<i64: 384, 128>}, {pipeline_mode = #tpu.pipeline_mode<synchronous>, transform_indices = @transform_2, window_bounds = array<i64: 8, 128>}, {transform_indices = @transform_3, window_bounds = array<i64: 8, 1>}]} {
    %c0 = arith.constant 0 : index
    %c0_0 = arith.constant 0 : index
    %0 = vector.load %arg1[%c0, %c0_0] : memref<8x128xbf16, #tpu.memory_space<vmem>>, vector<8x128xbf16>
    %c0_1 = arith.constant 0 : index
    %c0_2 = arith.constant 0 : index
    %1 = vector.load %arg2[%c0_1, %c0_2] : memref<384x128xbf16, #tpu.memory_space<vmem>>, vector<128x128xbf16>
    %cst = arith.constant dense<0.000000e+00> : vector<8x128xf32>
    %2 = tpu.matmul %0, %1, %cst {dimension_numbers = #tpu.dot_dimension_numbers<[1], [0], [0], [1], [0, 0, 1, 1], [], []>} : vector<8x128xbf16>, vector<128x128xbf16>, vector<8x128xf32> -> vector<8x128xf32>
    %c0_3 = arith.constant 0 : index
    %c0_4 = arith.constant 0 : index
    %3 = vector.load %arg3[%c0_3, %c0_4] : memref<8x128xf32, #tpu.memory_space<vmem>>, vector<1x128xf32>
    %4 = vector.broadcast %3 : vector<1x128xf32> to vector<8x128xf32>
    %5 = arith.addf %2, %4 : vector<8x128xf32>
    %cst_5 = arith.constant 0.00999999977 : f32
    %6 = vector.broadcast %cst_5 : f32 to vector<8x128xf32>
    %7 = arith.mulf %6, %5 : vector<8x128xf32>
    %8 = arith.maximumf %5, %7 : vector<8x128xf32>
    %c128 = arith.constant 128 : index
    %c0_6 = arith.constant 0 : index
    %9 = vector.load %arg2[%c128, %c0_6] : memref<384x128xbf16, #tpu.memory_space<vmem>>, vector<128x128xbf16>
    %10 = arith.truncf %8 : vector<8x128xf32> to vector<8x128xbf16>
    %cst_7 = arith.constant dense<0.000000e+00> : vector<8x128xf32>
    %11 = tpu.matmul %10, %9, %cst_7 {dimension_numbers = #tpu.dot_dimension_numbers<[1], [0], [0], [1], [0, 0, 1, 1], [], []>} : vector<8x128xbf16>, vector<128x128xbf16>, vector<8x128xf32> -> vector<8x128xf32>
    %c256 = arith.constant 256 : index
    %c0_8 = arith.constant 0 : index
    %12 = vector.load %arg2[%c256, %c0_8] : memref<384x128xbf16, #tpu.memory_space<vmem>>, vector<128x128xbf16>
    %cst_9 = arith.constant dense<0.000000e+00> : vector<8x128xf32>
    %13 = tpu.matmul %0, %12, %cst_9 {dimension_numbers = #tpu.dot_dimension_numbers<[1], [0], [0], [1], [0, 0, 1, 1], [], []>} : vector<8x128xbf16>, vector<128x128xbf16>, vector<8x128xf32> -> vector<8x128xf32>
    %14 = arith.addf %11, %13 : vector<8x128xf32>
    %c1 = arith.constant 1 : index
    %c0_10 = arith.constant 0 : index
    %15 = vector.load %arg3[%c1, %c0_10] : memref<8x128xf32, #tpu.memory_space<vmem>>, vector<1x128xf32>
    %16 = vector.broadcast %15 : vector<1x128xf32> to vector<8x128xf32>
    %17 = arith.addf %14, %16 : vector<8x128xf32>
    %cst_11 = arith.constant 0.00999999977 : f32
    %18 = vector.broadcast %cst_11 : f32 to vector<8x128xf32>
    %19 = arith.mulf %18, %17 : vector<8x128xf32>
    %20 = arith.maximumf %17, %19 : vector<8x128xf32>
    %c3 = arith.constant 3 : index
    %c0_12 = arith.constant 0 : index
    %21 = vector.load %arg3[%c3, %c0_12] : memref<8x128xf32, #tpu.memory_space<vmem>>, vector<1x128xf32>
    %22 = vector.broadcast %21 : vector<1x128xf32> to vector<8x128xf32>
    %23 = arith.mulf %20, %22 : vector<8x128xf32>
    %cst_13 = arith.constant dense<0.000000e+00> : vector<8xf32>
    %24 = vector.multi_reduction <add>, %23, %cst_13 [1] : vector<8x128xf32> to vector<8xf32>
    %25 = vector.shape_cast %24 : vector<8xf32> to vector<8x1xf32>
    %c2 = arith.constant 2 : index
    %c0_14 = arith.constant 0 : index
    %26 = vector.load %arg3[%c2, %c0_14] : memref<8x128xf32, #tpu.memory_space<vmem>>, vector<1x1xf32>
    %27 = vector.broadcast %26 : vector<1x1xf32> to vector<8x1xf32>
    %28 = arith.addf %25, %27 : vector<8x1xf32>
    %c0_15 = arith.constant 0 : index
    %c0_16 = arith.constant 0 : index
    %29 = vector.load %arg4[%c0_15, %c0_16] : memref<8x1xf32, #tpu.memory_space<vmem>>, vector<8x1xf32>
    tpu.vector_store %arg4[%c0_15, %c0_16], %28 {strides = array<i32>} : memref<8x1xf32, #tpu.memory_space<vmem>>, vector<8x1xf32>,
    return
  }
  func.func @transform_0(%arg0: i32) -> (i32, i32) {
    %c0_i32 = arith.constant 0 : i32
    %c0_i32_0 = arith.constant 0 : i32
    return %arg0, %c0_i32 : i32, i32
  }
  func.func @transform_1(%arg0: i32) -> (i32, i32) {
    %c0_i32 = arith.constant 0 : i32
    %c0_i32_0 = arith.constant 0 : i32
    %c0_i32_1 = arith.constant 0 : i32
    return %c0_i32, %c0_i32_0 : i32, i32
  }
  func.func @transform_2(%arg0: i32) -> (i32, i32) {
    %c0_i32 = arith.constant 0 : i32
    %c0_i32_0 = arith.constant 0 : i32
    %c0_i32_1 = arith.constant 0 : i32
    return %c0_i32, %c0_i32_0 : i32, i32
  }
  func.func @transform_3(%arg0: i32) -> (i32, i32) {
    %c0_i32 = arith.constant 0 : i32
    %c0_i32_0 = arith.constant 0 : i32
    return %arg0, %c0_i32 : i32, i32
  }
}

</mosaic_0001>

<bundles_post_ra>
// kernel: forward.1
= control target key start
LH: loop header
LB: loop body
LE: loop exit
PB: predicated region body
PF: predicated region fallthrough
CT: control target
= control target key end

     0   :  { %8 = vsyncpa [#allocation3], 0  ;;  %s547_s12 = smov [#allocation2]   ;;  %s632_s0 = inlined_call_operand.vmem [shape: bf16[8,128], index: 0, kind: input, shape index: {}]   ;;  %s633_s1 = inlined_call_operand.hbm [shape: bf16[384,128], index: 1, kind: input, shape index: {}]   ;;  %s634_s2 = inlined_call_operand.vmem [shape: f32[8,128], index: 2, kind: input, shape index: {}]   ;;  %s635_s3 = inlined_call_operand.vmem [shape: f32[8,1], index: 3, kind: output, shape index: {}]  }
   0x1   :  { %s16_s13 = sshll.u32 %s547_s12, 4  ;;  %s523_s16 = scalar_lea.hbm %s633_s1, 3072  ;;  %s17_s13 = int_to_ptr.vmem [resolvable:$true] %s16_s13 }
   0x2   :  { %p524_p0 = scmp.ne.s32.totalorder %s633_s1, %s523_s16  ;;  %p527_p1 = scmp.lt.u32.totalorder %s523_s16, %s633_s1 }
   0x4   :  { %p529_p2 = pnand %p527_p1, %p524_p0 }
   0x6   :  { %532 = shalt.err (!%p529_p2)
}
   0x7   :  { %s533_s21 = scalar_lea.vmem %s17_s13, 3072  ;;  %p538_p4 = scmp.lt.s32.totalorder %s17_s13, %s17_s13 }
   0x8   :  { %p534_p3 = scmp.ne.s32.totalorder %s17_s13, %s533_s21  ;;  %p539_p5 = scmp.lt.s32.totalorder %s533_s21, %s533_s21 }
   0xa   :  { %p540_p6 = por %p539_p5, %p538_p4 }
   0xc   :  { %p541_p7 = pnand %p540_p6, %p534_p3 }
   0xe   :  { %544 = shalt.err (!%p541_p7)
}
   0xf   :  { %s548_s22 = smov 64   ;;  %s549_s23 = smov 4  }
  0x10   :  { %22 = dma.hbm_to_vmem [thread:$0]  %s633_s1, 3072, %s17_s13, [#allocation3], %s548_s22, %s548_s22, %s549_s23  }
  0x11   :  { %545 = dma.done.wait [#allocation3], 3072  }
  0x12   :  { %546 = vsyncadd [#allocation3], 4294964224  ;;  %v550_v0 = vmov 0.0   ;;  %vm551_vm0 = vmmov 0   ;;  %v499_v1 = vld [vmem:[#allocation2] sm:$0xff]   ;;  %v500_v2 = vld [vmem:[#allocation2 + $0x8] sm:$0xff]  }
  0x13   :  { %434 = vmatprep.subr.bf16.mxu0 %v550_v0  ;;  %450 = vmatprep.mubr.msk.bf16.mxu0 %vm551_vm0, %v550_v0  ;;  %v501_v3 = vld [vmem:[#allocation2 + $0x10] sm:$0xff]   ;;  %v507_v4 = vld [vmem:[#allocation2 + $0x80] sm:$0xff]   ;;  %v502_v5 = vld [vmem:[#allocation2 + $0x18] sm:$0xff]   ;;  %vm372_vm1 = vcmask 7168  }
  0x14   :  { %454 = vmatprep.subr.bf16.mxu1 %v550_v0  ;;  %470 = vmatprep.mubr.msk.bf16.mxu1 %vm551_vm0, %v550_v0  ;;  %v509_v6 = vld [vmem:[#allocation2 + $0x88] sm:$0xff]   ;;  %v503_v7 = vld [vmem:[#allocation2 + $0x20] sm:$0xff]   ;;  %v511_v8 = vld [vmem:[#allocation2 + $0x90] sm:$0xff]  }
  0x15   :  { %435 = vmatpush3.bf16.msra.mxu0 %v499_v1  ;;  %455 = vmatpush3.bf16.msra.mxu1 %v507_v4  ;;  %v504_v9 = vld [vmem:[#allocation2 + $0x28] sm:$0xff]   ;;  %v513_v10 = vld [vmem:[#allocation2 + $0x98] sm:$0xff]   ;;  %v505_v11 = vld [vmem:[#allocation2 + $0x30] sm:$0xff]  }
  0x16   :  { %436 = vmatprep.subr.bf16.mxu0 %v550_v0  ;;  %456 = vmatprep.subr.bf16.mxu1 %v550_v0  ;;  %v515_v12 = vld [vmem:[#allocation2 + $0xa0] sm:$0xff]   ;;  %v506_v13 = vld [vmem:[#allocation2 + $0x38] sm:$0xff]   ;;  %v517_v14 = vld [vmem:[#allocation2 + $0xa8] sm:$0xff]  }
  0x17   :  { %v29_v15 = vld [vmem:[%s632_s0] sm:$0xf]  ;;  %v519_v17 = vld [vmem:[#allocation2 + $0xb0] sm:$0xff]   ;;  %v510_v18 = vld [vmem:[#allocation2 + $0x48] sm:$0xff]  }
  0x18   :  { %v508_v16 = vld [vmem:[#allocation2 + $0x40] sm:$0xff]   ;;  %v512_v19 = vld [vmem:[#allocation2 + $0x50] sm:$0xff]   ;;  %v514_v20 = vld [vmem:[#allocation2 + $0x58] sm:$0xff]  }
  0x19   :  { %437 = vmatpush3.bf16.msra.mxu0 %v500_v2  ;;  %457 = vmatpush3.bf16.msra.mxu1 %v509_v6  ;;  %v516_v21 = vld [vmem:[#allocation2 + $0x60] sm:$0xff]   ;;  %v518_v22 = vld [vmem:[#allocation2 + $0x68] sm:$0xff]   ;;  %v520_v23 = vld [vmem:[#allocation2 + $0x70] sm:$0xff]  }
  0x1a   :  { %438 = vmatprep.subr.bf16.mxu0 %v550_v0  ;;  %458 = vmatprep.subr.bf16.mxu1 %v550_v0  ;;  %v521_v24 = vld [vmem:[#allocation2 + $0xb8] sm:$0xff]   ;;  %v379_v26 = vld [vmem:[%s634_s2] ss:$0 sm:$0xff]  ;;  %v404_v40 = vld [vmem:[%s634_s2 + $0x1] ss:$0 sm:$0xff] }
  0x1b   :  { %v522_v25 = vld [vmem:[#allocation2 + $0x78] sm:$0xff]   ;;  %v405_v47 = vld [vmem:[%s634_s2 + $0x3] ss:$0 sm:$0xff]  ;;  %v406_v50 = vld [vmem:[%s634_s2 + $0x2] ss:$0 sm:$0xff] }
  0x1d   :  { %439 = vmatpush3.bf16.msra.mxu0 %v501_v3  ;;  %459 = vmatpush3.bf16.msra.mxu1 %v511_v8 }
  0x1e   :  { %440 = vmatprep.subr.bf16.mxu0 %v550_v0  ;;  %460 = vmatprep.subr.bf16.mxu1 %v550_v0 }
  0x21   :  { %441 = vmatpush3.bf16.msra.mxu0 %v502_v5  ;;  %461 = vmatpush3.bf16.msra.mxu1 %v513_v10 }
  0x22   :  { %442 = vmatprep.subr.bf16.mxu0 %v550_v0  ;;  %462 = vmatprep.subr.bf16.mxu1 %v550_v0 }
  0x25   :  { %443 = vmatpush3.bf16.msra.mxu0 %v503_v7  ;;  %463 = vmatpush3.bf16.msra.mxu1 %v515_v12 }
  0x26   :  { %444 = vmatprep.subr.bf16.mxu0 %v550_v0  ;;  %464 = vmatprep.subr.bf16.mxu1 %v550_v0 }
  0x29   :  { %445 = vmatpush3.bf16.msra.mxu0 %v504_v9  ;;  %465 = vmatpush3.bf16.msra.mxu1 %v517_v14 }
  0x2a   :  { %446 = vmatprep.subr.bf16.mxu0 %v550_v0  ;;  %466 = vmatprep.subr.bf16.mxu1 %v550_v0 }
  0x2d   :  { %447 = vmatpush3.bf16.msra.mxu0 %v505_v11  ;;  %467 = vmatpush3.bf16.msra.mxu1 %v519_v17 }
  0x2e   :  { %448 = vmatprep.subr.bf16.mxu0 %v550_v0  ;;  %468 = vmatprep.subr.bf16.mxu1 %v550_v0 }
  0x31   :  { %449 = vmatpush3.bf16.msra.mxu0 %v506_v13  ;;  %469 = vmatpush3.bf16.msra.mxu1 %v521_v24 }
  0x32   :  { %474 = vmatprep.subr.bf16.mxu0 %v550_v0 }
  0x34   :  { %451 = vmatmul.mubr.bf16.vlgmr.msra.gmra.mrb[0].mxu0 %v29_v15  ;;  %471 = vmatmul.mubr.bf16.vlgmr.msra.gmra.mrb[0].mxu1 %v29_v15 }
  0x35   :  { %475 = vmatpush3.bf16.msra.mxu0 %v508_v16  ;;  %490 = vmatprep.mubr.msk.bf16.mxu0 %vm551_vm0, %v550_v0 }
  0x36   :  { %476 = vmatprep.subr.bf16.mxu0 %v550_v0 }
  0x39   :  { %477 = vmatpush3.bf16.msra.mxu0 %v510_v18 }
  0x3a   :  { %478 = vmatprep.subr.bf16.mxu0 %v550_v0 }
  0x3d   :  { %479 = vmatpush3.bf16.msra.mxu0 %v512_v19 }
  0x3e   :  { %480 = vmatprep.subr.bf16.mxu0 %v550_v0 }
  0x41   :  { %481 = vmatpush3.bf16.msra.mxu0 %v514_v20 }
  0x42   :  { %482 = vmatprep.subr.bf16.mxu0 %v550_v0 }
  0x45   :  { %483 = vmatpush3.bf16.msra.mxu0 %v516_v21 }
  0x46   :  { %484 = vmatprep.subr.bf16.mxu0 %v550_v0 }
  0x49   :  { %485 = vmatpush3.bf16.msra.mxu0 %v518_v22 }
  0x4a   :  { %486 = vmatprep.subr.bf16.mxu0 %v550_v0 }
  0x4d   :  { %487 = vmatpush3.bf16.msra.mxu0 %v520_v23 }
  0x4e   :  { %488 = vmatprep.subr.bf16.mxu0 %v550_v0 }
  0x51   :  { %489 = vmatpush3.bf16.msra.mxu0 %v522_v25 }
 0x107   :  { %v133_v27 = vpop.f32.mrb[0].mxu0  ;;  %v256_v35 = vpop.f32.mrb[0].mxu1 }
 0x108   :  { %v134_v28 = vadd.f32 %v379_v26, %v133_v27  ;;  %v452_v29 = vpop.f32.mrb[1].mxu0  ;;  %v472_v36 = vpop.f32.mrb[1].mxu1 }
 0x109   :  { %v136_v30 = vpop.f32.mrb[2].mxu0  ;;  %v259_v37 = vpop.f32.mrb[2].mxu1 }
 0x10a   :  { %v139_v31 = vmul.f32 0.01, %v134_v28  ;;  %v453_v32 = vpop.f32.mrb[3].mxu0  ;;  %v473_v38 = vpop.f32.mrb[3].mxu1 }
 0x10c   :  { %v140_v33 = vmax.f32 %v134_v28, %v139_v31 }
 0x10e   :  { %v157_v34 = vpack.c.bf16 %v140_v33, %v140_v33 }
 0x110   :  { %491 = vmatmul.mubr.bf16.vlgmr.msra.gmra.mrb[4].mxu0 %v157_v34 }
 0x1e3   :  { %v344_v39 = vpop.f32.mrb[4].mxu0 }
 0x1e4   :  { %v345_v41 = vadd.f32 %v344_v39, %v256_v35  ;;  %v492_v42 = vpop.f32.mrb[5].mxu0 }
 0x1e5   :  { %v347_v43 = vpop.f32.mrb[6].mxu0 }
 0x1e6   :  { %v355_v44 = vadd.f32 %v404_v40, %v345_v41  ;;  %v493_v45 = vpop.f32.mrb[7].mxu0 }
 0x1e8   :  { %v356_v46 = vmul.f32 0.01, %v355_v44 }
 0x1ea   :  { %v357_v48 = vmax.f32 %v355_v44, %v356_v46 }
 0x1ec   :  { %v363_v49 = vmul.f32 %v405_v47, %v357_v48 }
 0x1ee   :  { %364 = vadd.xlane.f32.xlu0 %v363_v49 }
 0x27b   :  { %v365_v51 = vpop.xlane.xlu0 %364 }
 0x27c   :  { %v371_v52 = vadd.f32 %v406_v50, %v365_v51 }
 0x27e   :  { %373 = vst.msk [vmem:[%s635_s3] sm:$0xff] %vm372_vm1, %v371_v52 }
 0x27f   :  { %378 = vsyncpa [#allocation3], 1 }

</bundles_post_ra>
